<compile_context>
chip_gen: v7x
topology: tpu7x:2x2x1
jax: 0.10.0
libtpu: 0.0.40
codegen_flags: <defaults>
</compile_context>

<pallas_src>
import functools

import jax
import jax.numpy as jnp
from jax.experimental import pallas as pl
from jax.experimental.pallas import tpu as pltpu


def _round_up(x: int, m: int) -> int:
    return ((x + m - 1) // m) * m


# --------------------------------------------------------------------------------------
# Kernel: whole MLP fused.  3 MXU matmuls (bf16 in, f32 accumulate) + bias/ReLU on VPU.
# --------------------------------------------------------------------------------------
def mlp_kernel(x_ref, w1_ref, b1_ref, w2_ref, b2_ref, w3_ref, b3_ref, o_ref):
    x = x_ref[...].astype(jnp.bfloat16)                                 # (tb, K) cast in-kernel

    h1 = jnp.dot(x, w1_ref[...], preferred_element_type=jnp.float32)    # (tb, 256) f32 acc
    h1 = jnp.maximum(h1 + b1_ref[...], 0.0).astype(jnp.bfloat16)        # f32 VPU math -> bf16

    h2 = jnp.dot(h1, w2_ref[...], preferred_element_type=jnp.float32)   # (tb, 512) f32 acc
    h2 = jnp.maximum(h2 + b2_ref[...], 0.0).astype(jnp.bfloat16)

    out = jnp.dot(h2, w3_ref[...], preferred_element_type=jnp.float32) + b3_ref[...]
    o_ref[...] = out.astype(o_ref.dtype)                                # (tb, Np) lane-dense


# --------------------------------------------------------------------------------------
# One-time parameter preparation (hoisted out of the per-call path).
# --------------------------------------------------------------------------------------
def prepare_params(params):
    """Cast weights to bf16, biases to f32, and pad the output layer to a 128-lane
    multiple.  Call once; reuse the result for every forward call."""
    w1, b1 = params["w1"], params["b1"]
    w2, b2 = params["w2"], params["b2"]
    w3, b3 = params["w3"], params["b3"]
    output_dim = w3.shape[1]
    Np = _round_up(output_dim, 128)

    prepped = {
        "w1": w1.astype(jnp.bfloat16),
        "b1": b1.reshape(1, -1).astype(jnp.float32),
        "w2": w2.astype(jnp.bfloat16),
        "b2": b2.reshape(1, -1).astype(jnp.float32),
        "w3": jnp.pad(w3, ((0, 0), (0, Np - output_dim))).astype(jnp.bfloat16),
        "b3": jnp.pad(b3.reshape(1, -1), ((0, 0), (0, Np - output_dim))).astype(jnp.float32),
    }
    return prepped, output_dim


def _choose_tile(B: int, tb_max: int):
    """Balanced batch tiles; >= 2 tiles for large batches so both v7x TCs get work."""
    num_tiles = pl.cdiv(B, tb_max)
    if B > 256 and num_tiles < 2:
        num_tiles = 2
    tb = _round_up(pl.cdiv(B, num_tiles), 8)
    return tb, num_tiles


# --------------------------------------------------------------------------------------
# Forward pass.
# --------------------------------------------------------------------------------------
@functools.partial(jax.jit, static_argnames=("output_dim", "tb_max", "out_dtype"))
def generator_forward(x, prepped, *, output_dim, tb_max=512, out_dtype=jnp.bfloat16):
    """x: (B, input_dim) float32.  prepped: result of prepare_params().

    output_dim: logical (unpadded) output width (static).
    tb_max:     maximum batch tile; tiles are balanced across the grid.
    out_dtype:  writeback dtype (bf16 default; pass jnp.float32 for full precision).
    """
    B, K = x.shape
    w1, b1 = prepped["w1"], prepped["b1"]
    w2, b2 = prepped["w2"], prepped["b2"]
    w3, b3 = prepped["w3"], prepped["b3"]
    H1 = w1.shape[1]            # 256
    H2 = w2.shape[1]            # 512
    Np = w3.shape[1]            # round_up(output_dim, 128)

    # ---- batch tiling (balanced, minimal padding) -------------------------------------
    tb, num_tiles = _choose_tile(B, tb_max)
    Bp = tb * num_tiles
    grid = (num_tiles,)

    x_p = x if Bp == B else jnp.pad(x, ((0, Bp - B), (0, 0)))

    # ---- VMEM budget (double-buffered streamed tiles + resident weights) --------------
    out_itemsize = jnp.dtype(out_dtype).itemsize
    x_tile_bytes = tb * K * x.dtype.itemsize
    out_tile_bytes = tb * Np * out_itemsize
    w_bytes = (K * H1 + H1 * H2 + H2 * Np) * 2 + (H1 + H2 + Np) * 4
    act_bytes = tb * (H1 + H2) * 4
    needed = 2 * (x_tile_bytes + out_tile_bytes) + 2 * w_bytes + act_bytes
    vmem_limit = int(min(max(int(1.25 * needed), 8 << 20), 96 << 20))

    flops = 2 * Bp * (K * H1 + H1 * H2 + H2 * Np)
    bytes_accessed = Bp * K * x.dtype.itemsize + w_bytes + Bp * Np * out_itemsize

    out_p = pl.pallas_call(
        mlp_kernel,
        out_shape=jax.ShapeDtypeStruct((Bp, Np), out_dtype),
        grid_spec=pltpu.PrefetchScalarGridSpec(
            num_scalar_prefetch=0,
            grid=grid,
            in_specs=[
                pl.BlockSpec((tb, K), lambda i: (i, 0)),    # x tile (streamed, native K)
                pl.BlockSpec((K, H1), lambda i: (0, 0)),    # w1 (resident)
                pl.BlockSpec((1, H1), lambda i: (0, 0)),    # b1
                pl.BlockSpec((H1, H2), lambda i: (0, 0)),   # w2
                pl.BlockSpec((1, H2), lambda i: (0, 0)),    # b2
                pl.BlockSpec((H2, Np), lambda i: (0, 0)),   # w3 (padded once to Np)
                pl.BlockSpec((1, Np), lambda i: (0, 0)),    # b3
            ],
            out_specs=pl.BlockSpec((tb, Np), lambda i: (i, 0)),
        ),
        compiler_params=pltpu.CompilerParams(
            dimension_semantics=("parallel",),   # batch tiles shard across v7x's 2 TCs
            vmem_limit_bytes=vmem_limit,
        ),
        cost_estimate=pl.CostEstimate(
            flops=flops, transcendentals=0, bytes_accessed=bytes_accessed
        ),
    )(x_p, w1, b1, w2, b2, w3, b3)

    # Fast path: skip the (extra memory pass) slice when padding was a no-op.
    if Bp == B and Np == output_dim:
        return out_p
    return out_p[:B, :output_dim]


# --------------------------------------------------------------------------------------
# Host-side helpers for the self-test.
# --------------------------------------------------------------------------------------
def init_params(key, input_dim, output_dim):
    """Deterministic synthetic init (PyTorch-like uniform fan-in scaling)."""
    ks = jax.random.split(key, 6)

    def lin(kw, kb, fan_in, fan_out):
        bound = 1.0 / jnp.sqrt(fan_in)
        w = jax.random.uniform(kw, (fan_in, fan_out), jnp.float32, -bound, bound)
        b = jax.random.uniform(kb, (1, fan_out), jnp.float32, -bound, bound)
        return w, b

    w1, b1 = lin(ks[0], ks[1], input_dim, 256)
    w2, b2 = lin(ks[2], ks[3], 256, 512)
    w3, b3 = lin(ks[4], ks[5], 512, output_dim)
    return {"w1": w1, "b1": b1, "w2": w2, "b2": b2, "w3": w3, "b3": b3}


def reference_forward(x, p):
    h1 = jnp.maximum(x @ p["w1"] + p["b1"], 0.0)
    h2 = jnp.maximum(h1 @ p["w2"] + p["b2"], 0.0)
    return h2 @ p["w3"] + p["b3"]


if __name__ == "__main__":
    key = jax.random.PRNGKey(0)
    k_x, k_p = jax.random.split(key)

    B, input_dim, output_dim = 16, 32, 64
    x = jax.random.normal(k_x, (B, input_dim), jnp.float32)
    params = init_params(k_p, input_dim, output_dim)

    # One-time weight prep (bf16 cast + output padding) hoisted out of the forward pass.
    prepped, out_dim = prepare_params(params)

    out = generator_forward(x, prepped, output_dim=out_dim)
    out = jax.block_until_ready(out)

    ref = reference_forward(x, params)
    assert out.shape == (B, output_dim)
    # bf16 MXU inputs, f32 accumulation, bf16 writeback -> loose tolerance vs f32 ref.
    assert jnp.allclose(out.astype(jnp.float32), ref, atol=5e-2, rtol=5e-2), \
        "mismatch vs reference"

    print("KERNEL_OK")
</pallas_src>

<mosaic_0001>
module attributes {stable_mosaic.version = 11 : i64} {
  func.func @mlp_kernel(%arg0: i32, %arg1: memref<16x32xf32, #tpu.memory_space<vmem>>, %arg2: memref<32x256xbf16, #tpu.memory_space<vmem>>, %arg3: memref<1x256xf32, #tpu.memory_space<vmem>>, %arg4: memref<256x512xbf16, #tpu.memory_space<vmem>>, %arg5: memref<1x512xf32, #tpu.memory_space<vmem>>, %arg6: memref<512x128xbf16, #tpu.memory_space<vmem>>, %arg7: memref<1x128xf32, #tpu.memory_space<vmem>>, %arg8: memref<16x128xbf16, #tpu.memory_space<vmem>>) attributes {dimension_semantics = [#tpu.dimension_semantics<parallel>], iteration_bounds = array<i64: 1>, scalar_prefetch = 0 : i64, scratch_operands = 0 : i64, tpu.core_type = #tpu.core_type<tc>, window_params = [{transform_indices = @transform_0, window_bounds = array<i64: 16, 32>}, {pipeline_mode = #tpu.pipeline_mode<synchronous>, transform_indices = @transform_1, window_bounds = array<i64: 32, 256>}, {pipeline_mode = #tpu.pipeline_mode<synchronous>, transform_indices = @transform_2, window_bounds = array<i64: 1, 256>}, {pipeline_mode = #tpu.pipeline_mode<synchronous>, transform_indices = @transform_3, window_bounds = array<i64: 256, 512>}, {pipeline_mode = #tpu.pipeline_mode<synchronous>, transform_indices = @transform_4, window_bounds = array<i64: 1, 512>}, {pipeline_mode = #tpu.pipeline_mode<synchronous>, transform_indices = @transform_5, window_bounds = array<i64: 512, 128>}, {pipeline_mode = #tpu.pipeline_mode<synchronous>, transform_indices = @transform_6, window_bounds = array<i64: 1, 128>}, {transform_indices = @transform_7, window_bounds = array<i64: 16, 128>}]} {
    %c0 = arith.constant 0 : index
    %c0_0 = arith.constant 0 : index
    %0 = vector.load %arg1[%c0, %c0_0] : memref<16x32xf32, #tpu.memory_space<vmem>>, vector<16x32xf32>
    %1 = arith.truncf %0 : vector<16x32xf32> to vector<16x32xbf16>
    %c0_1 = arith.constant 0 : index
    %c0_2 = arith.constant 0 : index
    %2 = vector.load %arg2[%c0_1, %c0_2] : memref<32x256xbf16, #tpu.memory_space<vmem>>, vector<32x256xbf16>
    %cst = arith.constant dense<0.000000e+00> : vector<16x256xf32>
    %3 = tpu.matmul %1, %2, %cst {dimension_numbers = #tpu.dot_dimension_numbers<[1], [0], [0], [1], [0, 0, 1, 1], [], []>} : vector<16x32xbf16>, vector<32x256xbf16>, vector<16x256xf32> -> vector<16x256xf32>
    %c0_3 = arith.constant 0 : index
    %c0_4 = arith.constant 0 : index
    %4 = vector.load %arg3[%c0_3, %c0_4] : memref<1x256xf32, #tpu.memory_space<vmem>>, vector<1x256xf32>
    %5 = vector.broadcast %4 : vector<1x256xf32> to vector<16x256xf32>
    %6 = arith.addf %3, %5 : vector<16x256xf32>
    %cst_5 = arith.constant 0.000000e+00 : f32
    %7 = vector.broadcast %cst_5 : f32 to vector<16x256xf32>
    %8 = arith.maximumf %6, %7 : vector<16x256xf32>
    %9 = arith.truncf %8 : vector<16x256xf32> to vector<16x256xbf16>
    %c0_6 = arith.constant 0 : index
    %c0_7 = arith.constant 0 : index
    %10 = vector.load %arg4[%c0_6, %c0_7] : memref<256x512xbf16, #tpu.memory_space<vmem>>, vector<256x512xbf16>
    %cst_8 = arith.constant dense<0.000000e+00> : vector<16x512xf32>
    %11 = tpu.matmul %9, %10, %cst_8 {dimension_numbers = #tpu.dot_dimension_numbers<[1], [0], [0], [1], [0, 0, 1, 1], [], []>} : vector<16x256xbf16>, vector<256x512xbf16>, vector<16x512xf32> -> vector<16x512xf32>
    %c0_9 = arith.constant 0 : index
    %c0_10 = arith.constant 0 : index
    %12 = vector.load %arg5[%c0_9, %c0_10] : memref<1x512xf32, #tpu.memory_space<vmem>>, vector<1x512xf32>
    %13 = vector.broadcast %12 : vector<1x512xf32> to vector<16x512xf32>
    %14 = arith.addf %11, %13 : vector<16x512xf32>
    %cst_11 = arith.constant 0.000000e+00 : f32
    %15 = vector.broadcast %cst_11 : f32 to vector<16x512xf32>
    %16 = arith.maximumf %14, %15 : vector<16x512xf32>
    %17 = arith.truncf %16 : vector<16x512xf32> to vector<16x512xbf16>
    %c0_12 = arith.constant 0 : index
    %c0_13 = arith.constant 0 : index
    %18 = vector.load %arg6[%c0_12, %c0_13] : memref<512x128xbf16, #tpu.memory_space<vmem>>, vector<512x128xbf16>
    %cst_14 = arith.constant dense<0.000000e+00> : vector<16x128xf32>
    %19 = tpu.matmul %17, %18, %cst_14 {dimension_numbers = #tpu.dot_dimension_numbers<[1], [0], [0], [1], [0, 0, 1, 1], [], []>} : vector<16x512xbf16>, vector<512x128xbf16>, vector<16x128xf32> -> vector<16x128xf32>
    %c0_15 = arith.constant 0 : index
    %c0_16 = arith.constant 0 : index
    %20 = vector.load %arg7[%c0_15, %c0_16] : memref<1x128xf32, #tpu.memory_space<vmem>>, vector<1x128xf32>
    %21 = vector.broadcast %20 : vector<1x128xf32> to vector<16x128xf32>
    %22 = arith.addf %19, %21 : vector<16x128xf32>
    %23 = arith.truncf %22 : vector<16x128xf32> to vector<16x128xbf16>
    %c0_17 = arith.constant 0 : index
    %c0_18 = arith.constant 0 : index
    %24 = vector.load %arg8[%c0_17, %c0_18] : memref<16x128xbf16, #tpu.memory_space<vmem>>, vector<16x128xbf16>
    tpu.vector_store %arg8[%c0_17, %c0_18], %23 {strides = array<i32>} : memref<16x128xbf16, #tpu.memory_space<vmem>>, vector<16x128xbf16>,
    return
  }
  func.func @transform_0(%arg0: i32) -> (i32, i32) {
    %c0_i32 = arith.constant 0 : i32
    %c0_i32_0 = arith.constant 0 : i32
    return %arg0, %c0_i32 : i32, i32
  }
  func.func @transform_1(%arg0: i32) -> (i32, i32) {
    %c0_i32 = arith.constant 0 : i32
    %c0_i32_0 = arith.constant 0 : i32
    %c0_i32_1 = arith.constant 0 : i32
    return %c0_i32, %c0_i32_0 : i32, i32
  }
  func.func @transform_2(%arg0: i32) -> (i32, i32) {
    %c0_i32 = arith.constant 0 : i32
    %c0_i32_0 = arith.constant 0 : i32
    %c0_i32_1 = arith.constant 0 : i32
    return %c0_i32, %c0_i32_0 : i32, i32
  }
  func.func @transform_3(%arg0: i32) -> (i32, i32) {
    %c0_i32 = arith.constant 0 : i32
    %c0_i32_0 = arith.constant 0 : i32
    %c0_i32_1 = arith.constant 0 : i32
    return %c0_i32, %c0_i32_0 : i32, i32
  }
  func.func @transform_4(%arg0: i32) -> (i32, i32) {
    %c0_i32 = arith.constant 0 : i32
    %c0_i32_0 = arith.constant 0 : i32
    %c0_i32_1 = arith.constant 0 : i32
    return %c0_i32, %c0_i32_0 : i32, i32
  }
  func.func @transform_5(%arg0: i32) -> (i32, i32) {
    %c0_i32 = arith.constant 0 : i32
    %c0_i32_0 = arith.constant 0 : i32
    %c0_i32_1 = arith.constant 0 : i32
    return %c0_i32, %c0_i32_0 : i32, i32
  }
  func.func @transform_6(%arg0: i32) -> (i32, i32) {
    %c0_i32 = arith.constant 0 : i32
    %c0_i32_0 = arith.constant 0 : i32
    %c0_i32_1 = arith.constant 0 : i32
    return %c0_i32, %c0_i32_0 : i32, i32
  }
  func.func @transform_7(%arg0: i32) -> (i32, i32) {
    %c0_i32 = arith.constant 0 : i32
    %c0_i32_0 = arith.constant 0 : i32
    return %arg0, %c0_i32 : i32, i32
  }
}

</mosaic_0001>

<bundles_post_ra>
// kernel: generator_forward.1
= control target key start
LH: loop header
LB: loop body
LE: loop exit
PB: predicated region body
PF: predicated region fallthrough
CT: control target
= control target key end

     0   :  { %12 = vsyncpa [#allocation3], 0  ;;  %s1620_s0 = inlined_call_operand.hbm [shape: f32[16,32], index: 0, kind: input, shape index: {}]   ;;  %s1621_s1 = inlined_call_operand.hbm [shape: bf16[32,256], index: 1, kind: input, shape index: {}]   ;;  %s1622_s2 = inlined_call_operand.vmem [shape: f32[1,256], index: 2, kind: input, shape index: {}]   ;;  %s1623_s3 = inlined_call_operand.hbm [shape: bf16[256,512], index: 3, kind: input, shape index: {}]   ;;  %s1624_s4 = inlined_call_operand.vmem [shape: f32[1,512], index: 4, kind: input, shape index: {}]   ;;  %s1625_s5 = inlined_call_operand.hbm [shape: bf16[512,128], index: 5, kind: input, shape index: {}]   ;;  %s1626_s6 = inlined_call_operand.vmem [shape: f32[1,128], index: 6, kind: input, shape index: {}]   ;;  %s1627_s7 = inlined_call_operand.hbm [shape: bf16[16,128], index: 7, kind: output, shape index: {}]  }
   0x1   :  { %13 = vsyncpa [#allocation6], 0 }
   0x2   :  { %14 = vsyncpa [#allocation9], 0 }
   0x3   :  { %15 = vsyncpa [#allocation4], 0  ;;  %s1472_s24 = smov [#allocation5]   ;;  %s1473_s26 = smov [#allocation2]  }
   0x4   :  { %s33_s25 = sshll.u32 %s1472_s24, 4  ;;  %s21_s27 = sshll.u32 %s1473_s26, 4  ;;  %s34_s25 = int_to_ptr.vmem [resolvable:$true] %s33_s25  ;;  %s1524_s27 = int_to_ptr.vmem [resolvable:$true] %s21_s27 }
   0x5   :  { %s1354_s30 = scalar_lea.hbm %s1621_s1, 512 }
   0x6   :  { %p1355_p0 = scmp.ne.s32.totalorder %s1621_s1, %s1354_s30  ;;  %p1358_p1 = scmp.lt.u32.totalorder %s1354_s30, %s1621_s1 }
   0x8   :  { %p1360_p2 = pnand %p1358_p1, %p1355_p0 }
   0xa   :  { %1363 = shalt.err (!%p1360_p2)
}
   0xb   :  { %s1364_s12 = scalar_lea.vmem %s34_s25, 512  ;;  %p1369_p4 = scmp.lt.s32.totalorder %s34_s25, %s34_s25 }
   0xc   :  { %p1365_p3 = scmp.ne.s32.totalorder %s34_s25, %s1364_s12  ;;  %p1370_p5 = scmp.lt.s32.totalorder %s1364_s12, %s1364_s12 }
   0xe   :  { %p1371_p6 = por %p1370_p5, %p1369_p4 }
  0x10   :  { %p1372_p7 = pnand %p1371_p6, %p1365_p3 }
  0x12   :  { %1375 = shalt.err (!%p1372_p7)
}
  0x13   :  { %s1474_s13 = smov 128   ;;  %s1475_s14 = smov 8  }
  0x14   :  { %39 = dma.hbm_to_vmem [thread:$0]  %s1621_s1, 512, %s34_s25, [#allocation6], %s1474_s13, %s1474_s13, %s1475_s14  }
  0x15   :  { %s1376_s19 = scalar_lea.hbm %s1620_s0, 256 }
  0x16   :  { %p1377_p8 = scmp.ne.s32.totalorder %s1620_s0, %s1376_s19  ;;  %p1380_p9 = scmp.lt.u32.totalorder %s1376_s19, %s1620_s0 }
  0x18   :  { %p1382_p10 = pnand %p1380_p9, %p1377_p8 }
  0x1a   :  { %1385 = shalt.err (!%p1382_p10)
}
  0x1b   :  { %s1386_s24 = scalar_lea.vmem %s1524_s27, 256  ;;  %p1391_p12 = scmp.lt.s32.totalorder %s1524_s27, %s1524_s27 }
  0x1c   :  { %p1387_p11 = scmp.ne.s32.totalorder %s1524_s27, %s1386_s24  ;;  %p1392_p13 = scmp.lt.s32.totalorder %s1386_s24, %s1386_s24 }
  0x1e   :  { %p1393_p0 = por %p1392_p13, %p1391_p12 }
  0x20   :  { %p1394_p1 = pnand %p1393_p0, %p1387_p11 }
  0x22   :  { %1397 = shalt.err (!%p1394_p1)
}
  0x23   :  { %27 = dma.hbm_to_vmem [thread:$0]  %s1620_s0, 256, %s1524_s27, [#allocation3], %s1474_s13, %s1474_s13, %s1475_s14  }
  0x24   :  { %s1476_s26 = smov [#allocation7]   ;;  %s1398_s8 = scalar_lea.hbm %s1623_s3, 8192 }
  0x25   :  { %s47_s28 = sshll.u32 %s1476_s26, 4  ;;  %p1399_p2 = scmp.ne.s32.totalorder %s1623_s3, %s1398_s8  ;;  %s48_s28 = int_to_ptr.vmem [resolvable:$true] %s47_s28 }
  0x26   :  { %p1402_p3 = scmp.lt.u32.totalorder %s1398_s8, %s1623_s3 }
  0x28   :  { %p1404_p4 = pnand %p1402_p3, %p1399_p2 }
  0x2a   :  { %1407 = shalt.err (!%p1404_p4)
}
  0x2b   :  { %s1408_s15 = scalar_lea.vmem %s48_s28, 8192  ;;  %p1413_p6 = scmp.lt.s32.totalorder %s48_s28, %s48_s28 }
  0x2c   :  { %p1409_p5 = scmp.ne.s32.totalorder %s48_s28, %s1408_s15  ;;  %p1414_p7 = scmp.lt.s32.totalorder %s1408_s15, %s1408_s15 }
  0x2e   :  { %p1415_p8 = por %p1414_p7, %p1413_p6 }
  0x30   :  { %p1416_p9 = pnand %p1415_p8, %p1409_p5 }
  0x32   :  { %1419 = shalt.err (!%p1416_p9)
}
  0x33   :  { %s1477_s0 = smov 256   ;;  %s1478_s27 = smov 16  }
  0x34   :  { %53 = dma.hbm_to_vmem [thread:$0]  %s1623_s3, 8192, %s48_s28, [#allocation6], %s1477_s0, %s1477_s0, %s1478_s27  }
  0x35   :  { %s1479_s16 = smov [#allocation8]   ;;  %s1420_s20 = scalar_lea.hbm %s1625_s5, 4096 }
  0x36   :  { %s61_s17 = sshll.u32 %s1479_s16, 4  ;;  %p1421_p10 = scmp.ne.s32.totalorder %s1625_s5, %s1420_s20  ;;  %s62_s17 = int_to_ptr.vmem [resolvable:$true] %s61_s17 }
  0x37   :  { %p1424_p11 = scmp.lt.u32.totalorder %s1420_s20, %s1625_s5 }
  0x39   :  { %p1426_p12 = pnand %p1424_p11, %p1421_p10 }
  0x3b   :  { %1429 = shalt.err (!%p1426_p12)
}
  0x3c   :  { %s1430_s1 = scalar_lea.vmem %s62_s17, 4096  ;;  %p1435_p0 = scmp.lt.s32.totalorder %s62_s17, %s62_s17 }
  0x3d   :  { %p1431_p13 = scmp.ne.s32.totalorder %s62_s17, %s1430_s1  ;;  %p1436_p1 = scmp.lt.s32.totalorder %s1430_s1, %s1430_s1 }
  0x3f   :  { %p1437_p2 = por %p1436_p1, %p1435_p0 }
  0x41   :  { %p1438_p3 = pnand %p1437_p2, %p1431_p13 }
  0x43   :  { %1441 = shalt.err (!%p1438_p3)
}
  0x44   :  { %s1480_s3 = smov 64   ;;  %s1481_s25 = smov 4  }
  0x45   :  { %67 = dma.hbm_to_vmem [thread:$0]  %s1625_s5, 4096, %s62_s17, [#allocation9], %s1480_s3, %s1480_s3, %s1481_s25  }
  0x46   :  { %1464 = dma.done.wait [#allocation3], 256  }
  0x47   :  { %1465 = vsyncadd [#allocation3], 4294967040 }
  0x48   :  { %1466 = dma.done.wait [#allocation6], 8704  }
  0x49   :  { %1467 = vsyncadd [#allocation6], 4294958592 }
  0x4a   :  { %1468 = dma.done.wait [#allocation9], 4096  }
  0x4b   :  { %1469 = vsyncadd [#allocation9], 4294963200  ;;  %v1482_v0 = vmov 0   ;;  %v1220_v1 = vld [vmem:[#allocation5 + $0x4] ss:$8 sps:$4 sm:$0xff]   ;;  %v83_v5 = vld [vmem:[#allocation2] sm:$0xff] }
  0x4c   :  { %158 = vmatprep.mubr.bf16.mxu0 %v1482_v0  ;;  %v1222_v2 = vld [vmem:[#allocation5] ss:$8 sps:$4 sm:$0xff]   ;;  %126 = vmatprep.subr.bf16.mxu0 %v1220_v1  ;;  %v1223_v3 = vld [vmem:[#allocation5 + $0x14] ss:$8 sps:$4 sm:$0xff]   ;;  %v1225_v4 = vld [vmem:[#allocation5 + $0x10] ss:$8 sps:$4 sm:$0xff]  }
  0x4d   :  { %127 = vmatpush1.bf16.msra.mxu0 %v1222_v2  ;;  %v84_v6 = vld [vmem:[#allocation2 + $0x8] sm:$0xff]  ;;  %v1226_v7 = vld [vmem:[#allocation7 + $0x4] ss:$16 sps:$4 sm:$0xff]   ;;  %v1231_v9 = vld [vmem:[#allocation7] ss:$16 sps:$4 sm:$0xff]   ;;  %vm122_vm0 = vcmask 261120  }
  0x4e   :  { %128 = vmatprep.subr.bf16.mxu0 %v1223_v3  ;;  %v1230_v8 = vld [vmem:[#allocation7 + $0xc] ss:$16 sps:$4 sm:$0xff]   ;;  %v85_v10 = vpack.c.bf16 %v84_v6, %v83_v5  ;;  %581 = vmatprep.subr.bf16.mxu1 %v1226_v7  ;;  %v1232_v11 = vld [vmem:[#allocation7 + $0x24] ss:$16 sps:$4 sm:$0xff]   ;;  %v1228_v12 = vld [vmem:[#allocation7 + $0x8] ss:$16 sps:$4 sm:$0xff]  }
  0x4f   :  { %582 = vmatpush1.bf16.msra.mxu1 %v1231_v9  ;;  %v1236_v13 = vld [vmem:[#allocation7 + $0x2c] ss:$16 sps:$4 sm:$0xff]   ;;  %v1237_v14 = vld [vmem:[#allocation7 + $0x20] ss:$16 sps:$4 sm:$0xff]   ;;  %v1238_v15 = vld [vmem:[#allocation7 + $0x44] ss:$16 sps:$4 sm:$0xff]  }
  0x50   :  { %583 = vmatprep.subr.bf16.mxu1 %v1232_v11  ;;  %v1234_v16 = vld [vmem:[#allocation7 + $0x28] ss:$16 sps:$4 sm:$0xff]   ;;  %v1242_v17 = vld [vmem:[#allocation7 + $0x4c] ss:$16 sps:$4 sm:$0xff]   ;;  %v1243_v18 = vld [vmem:[#allocation7 + $0x40] ss:$16 sps:$4 sm:$0xff]  }
  0x51   :  { %129 = vmatpush1.bf16.msra.mxu0 %v1225_v4  ;;  %v1244_v19 = vld [vmem:[#allocation7 + $0x64] ss:$16 sps:$4 sm:$0xff]   ;;  %v1240_v20 = vld [vmem:[#allocation7 + $0x48] ss:$16 sps:$4 sm:$0xff]   ;;  %v1249_v21 = vld [vmem:[#allocation7 + $0x60] ss:$16 sps:$4 sm:$0xff]  }
  0x52   :  { %624 = vmatprep.subr.bf16.mxu0 %v1230_v8  ;;  %v1248_v22 = vld [vmem:[#allocation7 + $0x6c] ss:$16 sps:$4 sm:$0xff]   ;;  %v1250_v23 = vld [vmem:[#allocation7 + $0x84] ss:$16 sps:$4 sm:$0xff]   ;;  %v1246_v24 = vld [vmem:[#allocation7 + $0x68] ss:$16 sps:$4 sm:$0xff]  }
  0x53   :  { %584 = vmatpush1.bf16.msra.mxu1 %v1237_v14  ;;  %v1254_v25 = vld [vmem:[#allocation7 + $0x8c] ss:$16 sps:$4 sm:$0xff]   ;;  %v1255_v26 = vld [vmem:[#allocation7 + $0x80] ss:$16 sps:$4 sm:$0xff]   ;;  %v1256_v27 = vld [vmem:[#allocation7 + $0xa4] ss:$16 sps:$4 sm:$0xff]  }
  0x54   :  { %1057 = vmatmul.mubr.msk.bf16.vlgmr.msra.gmra.mrb[0].mxu0 %vm122_vm0, %v85_v10  ;;  %585 = vmatprep.subr.bf16.mxu1 %v1238_v15  ;;  %v1252_v28 = vld [vmem:[#allocation7 + $0x88] ss:$16 sps:$4 sm:$0xff]   ;;  %v1261_v29 = vld [vmem:[#allocation7 + $0xa0] ss:$16 sps:$4 sm:$0xff]   ;;  %v1260_v30 = vld [vmem:[#allocation7 + $0xac] ss:$16 sps:$4 sm:$0xff]   ;;  %v92_v10 = vlaneseq }
  0x55   :  { %625 = vmatpush1.bf16.msra.mxu0 %v1228_v12  ;;  %v1262_v31 = vld [vmem:[#allocation7 + $0xc4] ss:$16 sps:$4 sm:$0xff]   ;;  %v1258_v32 = vld [vmem:[#allocation7 + $0xa8] ss:$16 sps:$4 sm:$0xff]   ;;  %v1266_v33 = vld [vmem:[#allocation7 + $0xcc] ss:$16 sps:$4 sm:$0xff]  }
  0x56   :  { %626 = vmatprep.subr.bf16.mxu0 %v1236_v13  ;;  %v1267_v34 = vld [vmem:[#allocation7 + $0xc0] ss:$16 sps:$4 sm:$0xff]   ;;  %v1268_v35 = vld [vmem:[#allocation7 + $0xe4] ss:$16 sps:$4 sm:$0xff]   ;;  %v1264_v36 = vld [vmem:[#allocation7 + $0xc8] ss:$16 sps:$4 sm:$0xff]  }
  0x57   :  { %586 = vmatpush1.bf16.msra.mxu1 %v1243_v18  ;;  %v1273_v37 = vld [vmem:[#allocation7 + $0xe0] ss:$16 sps:$4 sm:$0xff]   ;;  %v1272_v38 = vld [vmem:[#allocation7 + $0xec] ss:$16 sps:$4 sm:$0xff]   ;;  %v1274_v39 = vld [vmem:[#allocation7 + $0x104] ss:$16 sps:$4 sm:$0xff]  }
  0x58   :  { %587 = vmatprep.subr.bf16.mxu1 %v1244_v19  ;;  %v1270_v40 = vld [vmem:[#allocation7 + $0xe8] ss:$16 sps:$4 sm:$0xff]   ;;  %v1278_v41 = vld [vmem:[#allocation7 + $0x10c] ss:$16 sps:$4 sm:$0xff]   ;;  %v1279_v42 = vld [vmem:[#allocation7 + $0x100] ss:$16 sps:$4 sm:$0xff]  }
  0x59   :  { %627 = vmatpush1.bf16.msra.mxu0 %v1234_v16  ;;  %v1280_v43 = vld [vmem:[#allocation7 + $0x124] ss:$16 sps:$4 sm:$0xff]   ;;  %v1276_v44 = vld [vmem:[#allocation7 + $0x108] ss:$16 sps:$4 sm:$0xff]   ;;  %v1285_v45 = vld [vmem:[#allocation7 + $0x120] ss:$16 sps:$4 sm:$0xff]  }
  0x5a   :  { %628 = vmatprep.subr.bf16.mxu0 %v1242_v17  ;;  %v1284_v46 = vld [vmem:[#allocation7 + $0x12c] ss:$16 sps:$4 sm:$0xff]   ;;  %v1286_v47 = vld [vmem:[#allocation7 + $0x144] ss:$16 sps:$4 sm:$0xff]   ;;  %v1282_v48 = vld [vmem:[#allocation7 + $0x128] ss:$16 sps:$4 sm:$0xff]  }
  0x5b   :  { %588 = vmatpush1.bf16.msra.mxu1 %v1249_v21  ;;  %v1291_v49 = vld [vmem:[#allocation7 + $0x140] ss:$16 sps:$4 sm:$0xff]   ;;  %v1290_v50 = vld [vmem:[#allocation7 + $0x14c] ss:$16 sps:$4 sm:$0xff]   ;;  %v1292_v51 = vld [vmem:[#allocation7 + $0x164] ss:$16 sps:$4 sm:$0xff]  }
  0x5c   :  { %589 = vmatprep.subr.bf16.mxu1 %v1250_v23  ;;  %v1288_v52 = vld [vmem:[#allocation7 + $0x148] ss:$16 sps:$4 sm:$0xff]   ;;  %v1297_v53 = vld [vmem:[#allocation7 + $0x160] ss:$16 sps:$4 sm:$0xff]   ;;  %v1296_v54 = vld [vmem:[#allocation7 + $0x16c] ss:$16 sps:$4 sm:$0xff]  }
  0x5d   :  { %629 = vmatpush1.bf16.msra.mxu0 %v1240_v20  ;;  %v1298_v55 = vld [vmem:[#allocation7 + $0x184] ss:$16 sps:$4 sm:$0xff]   ;;  %v1294_v56 = vld [vmem:[#allocation7 + $0x168] ss:$16 sps:$4 sm:$0xff]   ;;  %v1303_v57 = vld [vmem:[#allocation7 + $0x180] ss:$16 sps:$4 sm:$0xff]  }
  0x5e   :  { %630 = vmatprep.subr.bf16.mxu0 %v1248_v22  ;;  %v1302_v58 = vld [vmem:[#allocation7 + $0x18c] ss:$16 sps:$4 sm:$0xff]   ;;  %v1304_v59 = vld [vmem:[#allocation7 + $0x1a4] ss:$16 sps:$4 sm:$0xff]   ;;  %v1300_v60 = vld [vmem:[#allocation7 + $0x188] ss:$16 sps:$4 sm:$0xff]  }
  0x5f   :  { %590 = vmatpush1.bf16.msra.mxu1 %v1255_v26  ;;  %v1308_v61 = vld [vmem:[#allocation7 + $0x1ac] ss:$16 sps:$4 sm:$0xff]   ;;  %v1306_v62 = vld [vmem:[#allocation7 + $0x1a8] ss:$16 sps:$4 sm:$0xff]   ;;  %v1309_v63 = vld [vmem:[#allocation7 + $0x1a0] ss:$16 sps:$4 sm:$0xff]  }
  0x60   :  { %591 = vmatprep.subr.bf16.mxu1 %v1256_v27  ;;  %v1310_v0 = vld [vmem:[#allocation7 + $0x1c4] ss:$16 sps:$4 sm:$0xff]   ;;  %v1314_v1 = vld [vmem:[#allocation7 + $0x1cc] ss:$16 sps:$4 sm:$0xff]   ;;  %v1312_v2 = vld [vmem:[#allocation7 + $0x1c8] ss:$16 sps:$4 sm:$0xff]  }
  0x61   :  { %631 = vmatpush1.bf16.msra.mxu0 %v1246_v24  ;;  %v1315_v3 = vld [vmem:[#allocation7 + $0x1c0] ss:$16 sps:$4 sm:$0xff]   ;;  %v1316_v4 = vld [vmem:[#allocation7 + $0x1e4] ss:$16 sps:$4 sm:$0xff]   ;;  %v1320_v5 = vld [vmem:[#allocation7 + $0x1ec] ss:$16 sps:$4 sm:$0xff]  }
  0x62   :  { %632 = vmatprep.subr.bf16.mxu0 %v1254_v25  ;;  %v1318_v6 = vld [vmem:[#allocation7 + $0x1e8] ss:$16 sps:$4 sm:$0xff]   ;;  %v1321_v7 = vld [vmem:[#allocation7 + $0x1e0] ss:$16 sps:$4 sm:$0xff]   ;;  %v1582_v11 = vshrl.u32 %v92_v10, 7  ;;  %s1483_s9 = smov [#allocation10]  }
  0x63   :  { %592 = vmatpush1.bf16.msra.mxu1 %v1261_v29  ;;  %v1322_v8 = vld [vmem:[#allocation8 + $0x40] sm:$0xff]   ;;  %v90_v13 = vld [vmem:[%s1622_s2] sm:$0x3]  ;;  %s1039_s10 = sshll.u32 %s1483_s9, 4  ;;  %s1040_s10 = int_to_ptr.vmem [resolvable:$true] %s1039_s10 }
  0x64   :  { %593 = vmatprep.subr.bf16.mxu1 %v1262_v31  ;;  %v1323_v9 = vld [vmem:[#allocation8 + $0xc0] sm:$0xff]   ;;  %v94_v12 = vsub.s32 0, %v1582_v11  ;;  %v98_v14 = vsub.s32 1, %v1582_v11  ;;  %p1447_p5 = scmp.lt.s32.totalorder %s1040_s10, %s1040_s10 }
  0x65   :  { %633 = vmatpush1.bf16.msra.mxu0 %v1252_v28  ;;  %v1324_v31 = vld [vmem:[#allocation8] sm:$0xff]  }
  0x66   :  { %634 = vmatprep.subr.bf16.mxu0 %v1260_v30  ;;  %v95_v15 = vrot.slane %v90_v13, %v94_v12  ;;  %v99_v16 = vrot.slane %v90_v13, %v98_v14 }
  0x67   :  { %594 = vmatpush1.bf16.msra.mxu1 %v1267_v34  ;;  %v1327_v34 = vld [vmem:[#allocation8 + $0xc8] sm:$0xff]  }
  0x68   :  { %595 = vmatprep.subr.bf16.mxu1 %v1268_v35  ;;  %v1328_v35 = vld [vmem:[#allocation8 + $0x8] sm:$0xff]  }
  0x69   :  { %635 = vmatpush1.bf16.msra.mxu0 %v1258_v32  ;;  %v1325_v32 = vld [vmem:[#allocation8 + $0x80] sm:$0xff]  }
  0x6a   :  { %636 = vmatprep.subr.bf16.mxu0 %v1266_v33  ;;  %v1326_v33 = vld [vmem:[#allocation8 + $0x48] sm:$0xff]  }
  0x6b   :  { %596 = vmatpush1.bf16.msra.mxu1 %v1273_v37  ;;  %v1330_v37 = vld [vmem:[#allocation8 + $0x50] sm:$0xff]  }
  0x6c   :  { %597 = vmatprep.subr.bf16.mxu1 %v1274_v39  ;;  %v1332_v39 = vld [vmem:[#allocation8 + $0x10] sm:$0xff]  }
  0x6d   :  { %637 = vmatpush1.bf16.msra.mxu0 %v1264_v36  ;;  %v1329_v36 = vld [vmem:[#allocation8 + $0x88] sm:$0xff]  }
  0x6e   :  { %638 = vmatprep.subr.bf16.mxu0 %v1272_v38  ;;  %v1331_v38 = vld [vmem:[#allocation8 + $0xd0] sm:$0xff]  }
  0x6f   :  { %598 = vmatpush1.bf16.msra.mxu1 %v1279_v42  ;;  %v1335_v42 = vld [vmem:[#allocation8 + $0xd8] sm:$0xff]  }
  0x70   :  { %599 = vmatprep.subr.bf16.mxu1 %v1280_v43  ;;  %v1336_v43 = vld [vmem:[#allocation8 + $0x18] sm:$0xff]  }
  0x71   :  { %639 = vmatpush1.bf16.msra.mxu0 %v1270_v40  ;;  %v1333_v40 = vld [vmem:[#allocation8 + $0x90] sm:$0xff]  }
  0x72   :  { %640 = vmatprep.subr.bf16.mxu0 %v1278_v41  ;;  %v1334_v41 = vld [vmem:[#allocation8 + $0x58] sm:$0xff]  }
  0x73   :  { %600 = vmatpush1.bf16.msra.mxu1 %v1285_v45  ;;  %v1338_v45 = vld [vmem:[#allocation8 + $0x60] sm:$0xff]  }
  0x74   :  { %601 = vmatprep.subr.bf16.mxu1 %v1286_v47  ;;  %v1340_v47 = vld [vmem:[#allocation8 + $0x20] sm:$0xff]  }
  0x75   :  { %641 = vmatpush1.bf16.msra.mxu0 %v1276_v44  ;;  %v1337_v44 = vld [vmem:[#allocation8 + $0x98] sm:$0xff]  }
  0x76   :  { %642 = vmatprep.subr.bf16.mxu0 %v1284_v46  ;;  %v1339_v46 = vld [vmem:[#allocation8 + $0xe0] sm:$0xff]  }
  0x77   :  { %602 = vmatpush1.bf16.msra.mxu1 %v1291_v49  ;;  %v1342_v49 = vld [vmem:[#allocation8 + $0x68] sm:$0xff]  }
  0x78   :  { %603 = vmatprep.subr.bf16.mxu1 %v1292_v51  ;;  %v1344_v51 = vld [vmem:[#allocation8 + $0x28] sm:$0xff]  }
  0x79   :  { %643 = vmatpush1.bf16.msra.mxu0 %v1282_v48  ;;  %v1341_v48 = vld [vmem:[#allocation8 + $0xa0] sm:$0xff]  }
  0x7a   :  { %644 = vmatprep.subr.bf16.mxu0 %v1290_v50  ;;  %v1343_v50 = vld [vmem:[#allocation8 + $0xe8] sm:$0xff]  }
  0x7b   :  { %604 = vmatpush1.bf16.msra.mxu1 %v1297_v53  ;;  %v1346_v53 = vld [vmem:[#allocation8 + $0x70] sm:$0xff]  }
  0x7c   :  { %605 = vmatprep.subr.bf16.mxu1 %v1298_v55  ;;  %v1348_v55 = vld [vmem:[#allocation8 + $0x30] sm:$0xff]  }
  0x7d   :  { %645 = vmatpush1.bf16.msra.mxu0 %v1288_v52  ;;  %v1345_v52 = vld [vmem:[#allocation8 + $0xa8] sm:$0xff]  }
  0x7e   :  { %646 = vmatprep.subr.bf16.mxu0 %v1296_v54  ;;  %v1347_v54 = vld [vmem:[#allocation8 + $0xf0] sm:$0xff]  }
  0x7f   :  { %606 = vmatpush1.bf16.msra.mxu1 %v1303_v57  ;;  %v1350_v57 = vld [vmem:[#allocation8 + $0x78] sm:$0xff]  }
  0x80   :  { %607 = vmatprep.subr.bf16.mxu1 %v1304_v59  ;;  %v1352_v59 = vld [vmem:[#allocation8 + $0x38] sm:$0xff]  }
  0x81   :  { %647 = vmatpush1.bf16.msra.mxu0 %v1294_v56  ;;  %v1349_v56 = vld [vmem:[#allocation8 + $0xb0] sm:$0xff]  }
  0x82   :  { %648 = vmatprep.subr.bf16.mxu0 %v1302_v58  ;;  %v1351_v58 = vld [vmem:[#allocation8 + $0xf8] sm:$0xff]  }
  0x83   :  { %608 = vmatpush1.bf16.msra.mxu1 %v1309_v63  ;;  %v255_v63 = vsub.s32 3, %v1582_v11 }
  0x84   :  { %609 = vmatprep.subr.bf16.mxu1 %v1310_v0 }
  0x85   :  { %649 = vmatpush1.bf16.msra.mxu0 %v1300_v60  ;;  %v1353_v60 = vld [vmem:[#allocation8 + $0xb8] sm:$0xff]  }
  0x86   :  { %650 = vmatprep.subr.bf16.mxu0 %v1308_v61  ;;  %v251_v61 = vsub.s32 2, %v1582_v11 }
  0x87   :  { %610 = vmatpush1.bf16.msra.mxu1 %v1315_v3 }
  0x88   :  { %611 = vmatprep.subr.bf16.mxu1 %v1316_v4 }
  0x89   :  { %651 = vmatpush1.bf16.msra.mxu0 %v1306_v62  ;;  %v239_v62 = vld [vmem:[%s1624_s4] sm:$0xf] }
  0x8a   :  { %652 = vmatprep.subr.bf16.mxu0 %v1314_v1  ;;  %v244_v0 = vrot.slane %v239_v62, %v94_v12  ;;  %v252_v1 = vrot.slane %v239_v62, %v251_v61  ;;  %v256_v3 = vrot.slane %v239_v62, %v255_v63 }
  0x8b   :  { %612 = vmatpush1.bf16.msra.mxu1 %v1321_v7 }
  0x8c   :  { %1164 = vmatprep.subr.bf16.mxu1 %v1322_v8 }
  0x8d   :  { %653 = vmatpush1.bf16.msra.mxu0 %v1312_v2  ;;  %v248_v2 = vrot.slane %v239_v62, %v98_v14 }
  0x8e   :  { %654 = vmatprep.subr.bf16.mxu0 %v1320_v5 }
  0x91   :  { %655 = vmatpush1.bf16.msra.mxu0 %v1318_v6 }
  0x92   :  { %1186 = vmatprep.subr.bf16.mxu0 %v1323_v9 }
 0x127   :  { %v160_v17 = vpop.f32.mrb[0].mxu0 }
 0x128   :  { %v161_v18 = vadd.f32 %v160_v17, %v95_v15  ;;  %v162_v19 = vpop.f32.mrb[1].mxu0 }
 0x129   :  { %v163_v20 = vadd.f32 %v162_v19, %v99_v16  ;;  %v164_v21 = vpop.f32.mrb[2].mxu0 }
 0x12a   :  { %v165_v22 = vadd.f32 %v164_v21, %v95_v15  ;;  %v166_v23 = vpop.f32.mrb[3].mxu0  ;;  %v169_v25 = vmax.f32 %v161_v18, 0.0 }
 0x12b   :  { %v167_v24 = vadd.f32 %v166_v23, %v99_v16  ;;  %v170_v27 = vmax.f32 %v163_v20, 0.0 }
 0x12c   :  { %v171_v26 = vmax.f32 %v165_v22, 0.0 }
 0x12d   :  { %v172_v28 = vmax.f32 %v167_v24, 0.0 }
 0x12e   :  { %v173_v29 = vpack.c.bf16 %v171_v26, %v169_v25 }
 0x12f   :  { %v174_v30 = vpack.c.bf16 %v172_v28, %v170_v27 }
 0x131   :  { %613 = vmatprep.mubr.bf16.mxu1 %v174_v30  ;;  %656 = vmatprep.mubr.bf16.mxu0 %v174_v30 }
 0x132   :  { %614 = vmatmul.mubr.bf16.vlgmr.msra.gmra.mrb[0].mxu1 %v173_v29  ;;  %657 = vmatmul.mubr.bf16.vlgmr.msra.gmra.mrb[4].mxu0 %v173_v29 }
 0x133   :  { %1165 = vmatpush3.bf16.msra.mxu1 %v1324_v31  ;;  %1187 = vmatpush3.bf16.msra.mxu0 %v1325_v32 }
 0x134   :  { %1166 = vmatprep.subr.bf16.mxu1 %v1326_v33  ;;  %1188 = vmatprep.subr.bf16.mxu0 %v1327_v34  ;;  %v1122_v34 = vld [vmem:[%s1626_s6] ss:$0 sm:$0xff]  ;;  %s1442_s6 = scalar_lea.vmem %s1040_s10, 128 }
 0x135   :  { %p1443_p4 = scmp.ne.s32.totalorder %s1040_s10, %s1442_s6  ;;  %p1448_p6 = scmp.lt.s32.totalorder %s1442_s6, %s1442_s6 }
 0x137   :  { %1167 = vmatpush3.bf16.msra.mxu1 %v1328_v35  ;;  %1189 = vmatpush3.bf16.msra.mxu0 %v1329_v36  ;;  %p1449_p7 = por %p1448_p6, %p1447_p5 }
 0x138   :  { %1168 = vmatprep.subr.bf16.mxu1 %v1330_v37  ;;  %1190 = vmatprep.subr.bf16.mxu0 %v1331_v38 }
 0x139   :  { %p1450_p8 = pnand %p1449_p7, %p1443_p4 }
 0x13b   :  { %1169 = vmatpush3.bf16.msra.mxu1 %v1332_v39  ;;  %1191 = vmatpush3.bf16.msra.mxu0 %v1333_v40 }
 0x13c   :  { %1170 = vmatprep.subr.bf16.mxu1 %v1334_v41  ;;  %1192 = vmatprep.subr.bf16.mxu0 %v1335_v42 }
 0x13f   :  { %1171 = vmatpush3.bf16.msra.mxu1 %v1336_v43  ;;  %1193 = vmatpush3.bf16.msra.mxu0 %v1337_v44 }
 0x140   :  { %1172 = vmatprep.subr.bf16.mxu1 %v1338_v45  ;;  %1194 = vmatprep.subr.bf16.mxu0 %v1339_v46 }
 0x143   :  { %1173 = vmatpush3.bf16.msra.mxu1 %v1340_v47  ;;  %1195 = vmatpush3.bf16.msra.mxu0 %v1341_v48 }
 0x144   :  { %1174 = vmatprep.subr.bf16.mxu1 %v1342_v49  ;;  %1196 = vmatprep.subr.bf16.mxu0 %v1343_v50 }
 0x147   :  { %1175 = vmatpush3.bf16.msra.mxu1 %v1344_v51  ;;  %1197 = vmatpush3.bf16.msra.mxu0 %v1345_v52 }
 0x148   :  { %1176 = vmatprep.subr.bf16.mxu1 %v1346_v53  ;;  %1198 = vmatprep.subr.bf16.mxu0 %v1347_v54 }
 0x14b   :  { %1177 = vmatpush3.bf16.msra.mxu1 %v1348_v55  ;;  %1199 = vmatpush3.bf16.msra.mxu0 %v1349_v56 }
 0x14c   :  { %1178 = vmatprep.subr.bf16.mxu1 %v1350_v57  ;;  %1200 = vmatprep.subr.bf16.mxu0 %v1351_v58 }
 0x14f   :  { %1179 = vmatpush3.bf16.msra.mxu1 %v1352_v59  ;;  %1201 = vmatpush3.bf16.msra.mxu0 %v1353_v60 }
 0x205   :  { %v615_v4 = vpop.f32.mrb[0].mxu1  ;;  %v658_v5 = vpop.f32.mrb[4].mxu0 }
 0x206   :  { %v616_v6 = vadd.f32 %v615_v4, %v244_v0  ;;  %v659_v7 = vadd.f32 %v658_v5, %v252_v1  ;;  %v617_v8 = vpop.f32.mrb[1].mxu1  ;;  %v660_v9 = vpop.f32.mrb[5].mxu0 }
 0x207   :  { %v618_v10 = vadd.f32 %v617_v8, %v248_v2  ;;  %v661_v13 = vadd.f32 %v660_v9, %v256_v3  ;;  %v619_v15 = vpop.f32.mrb[2].mxu1  ;;  %v662_v16 = vpop.f32.mrb[6].mxu0 }
 0x208   :  { %v620_v17 = vadd.f32 %v619_v15, %v244_v0  ;;  %v663_v18 = vadd.f32 %v662_v16, %v252_v1  ;;  %v621_v19 = vpop.f32.mrb[3].mxu1  ;;  %v664_v20 = vpop.f32.mrb[7].mxu0  ;;  %v667_v22 = vmax.f32 %v616_v6, 0.0  ;;  %v669_v11 = vmax.f32 %v659_v7, 0.0 }
 0x209   :  { %v622_v12 = vadd.f32 %v621_v19, %v248_v2  ;;  %v665_v21 = vadd.f32 %v664_v20, %v256_v3  ;;  %v668_v24 = vmax.f32 %v618_v10, 0.0  ;;  %v670_v25 = vmax.f32 %v661_v13, 0.0 }
 0x20a   :  { %v671_v14 = vmax.f32 %v620_v17, 0.0  ;;  %v673_v23 = vmax.f32 %v663_v18, 0.0 }
 0x20b   :  { %v672_v26 = vmax.f32 %v622_v12, 0.0  ;;  %v674_v27 = vmax.f32 %v665_v21, 0.0 }
 0x20c   :  { %v675_v28 = vpack.c.bf16 %v671_v14, %v667_v22  ;;  %v677_v29 = vpack.c.bf16 %v673_v23, %v669_v11 }
 0x20d   :  { %v676_v30 = vpack.c.bf16 %v672_v26, %v668_v24  ;;  %v678_v31 = vpack.c.bf16 %v674_v27, %v670_v25 }
 0x20f   :  { %974 = vmatprep.mubr.bf16.mxu1 %v676_v30  ;;  %1015 = vmatprep.mubr.bf16.mxu0 %v678_v31 }
 0x210   :  { %975 = vmatmul.mubr.bf16.vlgmr.msra.gmra.mrb[4].mxu1 %v675_v28  ;;  %1016 = vmatmul.mubr.bf16.vlgmr.msra.gmra.mrb[8].mxu0 %v677_v29 }
 0x2e3   :  { %v1180_v32 = vpop.f32.mrb[4].mxu1  ;;  %v1202_v33 = vpop.f32.mrb[8].mxu0 }
 0x2e4   :  { %v1181_v35 = vpop.f32.mrb[5].mxu1  ;;  %v1203_v36 = vpop.f32.mrb[9].mxu0 }
 0x2e5   :  { %v1182_v37 = vadd.f32 %v1181_v35, %v1180_v32  ;;  %v1204_v38 = vadd.f32 %v1203_v36, %v1202_v33  ;;  %v1183_v39 = vpop.f32.mrb[6].mxu1  ;;  %v1205_v40 = vpop.f32.mrb[10].mxu0 }
 0x2e6   :  { %v1184_v41 = vpop.f32.mrb[7].mxu1  ;;  %v1206_v42 = vpop.f32.mrb[11].mxu0 }
 0x2e7   :  { %v977_v43 = vadd.f32 %v1182_v37, %v1122_v34  ;;  %v1185_v44 = vadd.f32 %v1184_v41, %v1183_v39  ;;  %v1207_v45 = vadd.f32 %v1206_v42, %v1205_v40 }
 0x2e9   :  { %v1018_v46 = vadd.f32 %v1204_v38, %v977_v43  ;;  %v980_v47 = vadd.f32 %v1185_v44, %v1122_v34 }
 0x2eb   :  { %v1021_v48 = vadd.f32 %v1207_v45, %v980_v47 }
 0x2ed   :  { %v1162_v49 = vpack.c.bf16 %v1021_v48, %v1018_v46 }
 0x2ef   :  { %1163 = vst [vmem:[#allocation10] sm:$0xff] %v1162_v49  }
 0x2f0   :  { %1453 = shalt.err (!%p1450_p8)
}
 0x2f1   :  { %s1454_s15 = scalar_lea.hbm %s1627_s7, 128 }
 0x2f2   :  { %p1455_p9 = scmp.ne.s32.totalorder %s1627_s7, %s1454_s15  ;;  %p1458_p10 = scmp.lt.u32.totalorder %s1454_s15, %s1627_s7 }
 0x2f4   :  { %p1460_p11 = pnand %p1458_p10, %p1455_p9 }
 0x2f6   :  { %1463 = shalt.err (!%p1460_p11)
}
 0x2f7   :  { %1045 = dma.vmem_to_hbm [thread:$0]  %s1040_s10, 128, %s1627_s7, [#allocation4], %s1480_s3, %s1480_s3, %s1481_s25  }
 0x2f8   :  { %1470 = dma.done.wait [#allocation4], 128  }
 0x2f9   :  { %1471 = vsyncadd [#allocation4], 4294967168 }
 0x2fa   :  { %1049 = vsyncpa [#allocation3], 1 }
 0x2fb   :  { %1050 = vsyncpa [#allocation6], 1 }
 0x2fc   :  { %1051 = vsyncpa [#allocation9], 1 }
 0x2fd   :  { %1052 = vsyncpa [#allocation4], 1 }

</bundles_post_ra>
